<compile_context>
chip_gen: v7x
topology: tpu7x:2x2x1
jax: 0.10.0
libtpu: 0.0.40
codegen_flags: <defaults>
</compile_context>

<pallas_src>
import numpy as np
import jax
import jax.numpy as jnp
from jax.experimental import pallas as pl
from jax.experimental.pallas import tpu as pltpu

_LANE = 128
_SUBLANE = 8
_VMEM_FALLBACK_BYTES = 48 * 1024 * 1024
_VMEM_LIMIT_CACHE = None


def _round_up(x, m):
    return (x + m - 1) // m * m


def _vmem_limit_bytes():
    """Per-generation VMEM budget: ~70% of physical capacity.

    ~90 MiB on 128 MiB parts (v5e/v6e), ~45 MiB on v7x (64 MiB physical).
    Falls back to a conservative constant if the query is unavailable.
    """
    global _VMEM_LIMIT_CACHE
    if _VMEM_LIMIT_CACHE is None:
        limit = _VMEM_FALLBACK_BYTES
        try:
            info = pltpu.get_tpu_info()
            cap = None
            for name in ("vmem_capacity_bytes", "vmem_size_bytes", "vmem_bytes"):
                cap = getattr(info, name, None)
                if cap:
                    break
            if cap:
                limit = max(32 * 1024 * 1024, (int(cap) * 7) // 10)
        except Exception:
            pass
        _VMEM_LIMIT_CACHE = limit
    return _VMEM_LIMIT_CACHE


def _largest_divisor_tile(dim_p, candidates):
    """Largest candidate that exactly divides dim_p (dim_p is a multiple of 128)."""
    for t in candidates:
        if dim_p % t == 0:
            return t
    return _LANE


# ----------------------------------------------------------------------------
# Pallas kernels
# ----------------------------------------------------------------------------
def _conv2d_kernel(x_ref, w_ref, o_ref):
    """One (batch, Cout-tile, H-strip) grid step of the KW-folded conv.

    x_ref: (1, 1, TH+KH-1, Wout, cin_f)  halo H-strip; channels = KW-folded Cin
    w_ref: (KH, cin_f, tc)               KW-folded weight slice (resident over the H sweep)
    o_ref: (1, TH, Wout, tc)             lane-dense output tile
    """
    th = o_ref.shape[1]
    kh_taps = w_ref.shape[0]
    acc = None
    for kh in range(kh_taps):  # static unroll: KH deep matmuls, K = KW*Cin (>=128)
        # Slicing the leading (non-tiled) strip axis selects whole (8,128) slabs:
        # no relayout copy, unlike the old per-(kh,kw) sublane-offset slices.
        patch = x_ref[0, 0, pl.ds(kh, th), :, :]          # (TH, Wout, cin_f)
        tap = jnp.einsum("hwc,cd->hwd", patch, w_ref[kh],
                         preferred_element_type=jnp.float32)
        acc = tap if acc is None else acc + tap
    o_ref[0] = acc.astype(o_ref.dtype)                    # single store per step


def _linear_kernel(x_ref, w_ref, o_ref, acc_ref):
    """One (TM, TN) tile of x @ w with a K-reduction grid axis.

    x_ref: (TM, TK), w_ref: (TK, TN), o_ref: (TM, TN), acc_ref: (TM, TN) f32
    """
    @pl.when(pl.program_id(2) == 0)
    def _():
        acc_ref[...] = jnp.zeros_like(acc_ref)

    acc_ref[...] += jnp.dot(x_ref[...], w_ref[...],
                            preferred_element_type=jnp.float32)

    @pl.when(pl.program_id(2) == pl.num_programs(2) - 1)
    def _():
        o_ref[...] = acc_ref[...].astype(o_ref.dtype)


# ----------------------------------------------------------------------------
# Weight normalization glue (cheap, plain JAX)
# ----------------------------------------------------------------------------
def _normalize_weight(w, gain, eps=1e-4):
    """Replicates normalize(w) * (gain / sqrt(w[0].numel())) from the module."""
    w = w.astype(jnp.float32)
    fan_in = int(np.prod(w.shape[1:]))
    norm = jnp.sqrt(jnp.sum(w * w, axis=tuple(range(1, w.ndim)), keepdims=True))
    # normalize(): norm = eps + norm * sqrt(norm.numel() / w.numel())
    #            = eps + norm / sqrt(fan_in)
    norm = eps + norm * np.sqrt(1.0 / fan_in)
    return (w / norm) * (gain / np.sqrt(fan_in))


# ----------------------------------------------------------------------------
# Forward helpers
# ----------------------------------------------------------------------------
def _mp_linear(x, w):
    """x @ w.T with w (Cout, Cin): tiled MXU matmul."""
    B, Cin = x.shape
    Cout = w.shape[0]
    vmem_limit = _vmem_limit_bytes()

    # Lane-dense padding: Cin/Cout -> multiples of 128, B -> multiple of 8.
    cin_p = _round_up(Cin, _LANE)
    cout_p = _round_up(Cout, _LANE)
    if B <= 512:
        b_p = _round_up(B, _SUBLANE)
        tm = b_p
    else:
        b_p = _round_up(B, 256)
        tm = 512 if b_p % 512 == 0 else 256

    if tm <= 64:
        # Small-batch fast path: weight-streaming bound.  Fat, lane-dense weight
        # tiles (fewer, larger grid steps) amortize per-step overhead and DMAs.
        tn = _largest_divisor_tile(cout_p, (1024, 768, 512, 384, 256, 128))
        tk = _largest_divisor_tile(cin_p, (2048, 1024, 512, 384, 256, 128))
    else:
        # Large-problem path: 512-wide tiles where they divide exactly.
        tn = _largest_divisor_tile(cout_p, (512, 384, 256, 128))
        tk = _largest_divisor_tile(cin_p, (512, 384, 256, 128))

    # Pre-transposed (Cin, Cout) weight: no in-kernel transpose / relayout.
    if cin_p == Cin and cout_p == Cout:
        w_t = w.T
    else:
        w_t = jnp.zeros((cin_p, cout_p), w.dtype).at[:Cin, :Cout].set(w.T)
    if b_p == B and cin_p == Cin:
        x_p = x
    else:
        x_p = jnp.zeros((b_p, cin_p), x.dtype).at[:B, :Cin].set(x)

    grid = (b_p // tm, cout_p // tn, cin_p // tk)
    flops = 2 * B * Cin * Cout
    bytes_accessed = int(x_p.size * x_p.dtype.itemsize
                         + w_t.size * w_t.dtype.itemsize
                         + b_p * cout_p * x.dtype.itemsize)

    out = pl.pallas_call(
        _linear_kernel,
        out_shape=jax.ShapeDtypeStruct((b_p, cout_p), x.dtype),
        grid=grid,
        in_specs=[
            pl.BlockSpec((tm, tk), lambda i, j, k: (i, k)),
            pl.BlockSpec((tk, tn), lambda i, j, k: (k, j)),
        ],
        out_specs=pl.BlockSpec((tm, tn), lambda i, j, k: (i, j)),
        scratch_shapes=[pltpu.VMEM((tm, tn), jnp.float32)],
        compiler_params=pltpu.CompilerParams(
            dimension_semantics=("parallel", "parallel", "arbitrary"),
            vmem_limit_bytes=vmem_limit),
        cost_estimate=pl.CostEstimate(flops=flops, transcendentals=0,
                                      bytes_accessed=bytes_accessed),
    )(x_p, w_t)
    return out[:B, :Cout]


def _mp_conv2d(x, w):
    """'same'-padded conv2d with NCHW x and OIHW w (already normalized)."""
    N, Cin, H, W = x.shape
    Cout, _, KH, KW = w.shape
    pad = KW // 2                  # torch: padding=(w.shape[-1]//2,) -> both dims
    Hp, Wp = H + 2 * pad, W + 2 * pad
    Hout = Hp - KH + 1             # consistent with the chosen padding
    Wout = Wp - KW + 1

    vmem_limit = _vmem_limit_bytes()
    isz = x.dtype.itemsize

    cout_p = _round_up(Cout, _LANE)
    cin_fold = KW * Cin                      # KW taps folded into the channel axis
    cin_f = _round_up(cin_fold, _LANE)       # lane-dense contraction depth

    # Cout tile: as wide as the (double-buffered) weight tile budget allows.
    # Wider tc => fewer Cout tiles => fewer input-strip re-reads with h innermost.
    tc = _LANE
    for cand in (512, 384, 256, 128):
        if cout_p % cand == 0 and 2 * KH * cin_f * cand * isz <= vmem_limit // 3:
            tc = cand
            break

    # H-strip rows per grid step: bounded by a VMEM budget covering the
    # double-buffered input strip + output tile + f32 accumulator; prefer a
    # multiple of 8; last strip is padded/cropped (no exact-divisor collapse).
    per_row = Wout * (2 * cin_f * isz + 2 * tc * isz + 8 * tc)
    row_budget = max(per_row, vmem_limit // 2 - 2 * KH * cin_f * tc * isz)
    th = min(row_budget // per_row, _round_up(Hout, _SUBLANE))
    if th >= _SUBLANE:
        th -= th % _SUBLANE
    th = max(int(th), 1)
    n_h = pl.cdiv(Hout, th)
    hout_pad = n_h * th
    th_halo = th + KH - 1

    # ---- wrapper-side layout prep (plain JAX / XLA) ----
    # NCHW -> NHWC, spatial zero-pad, extra bottom rows to cover the padded strips.
    x_nhwc = jnp.transpose(x, (0, 2, 3, 1))
    x_sp = jnp.pad(x_nhwc, ((0, 0), (pad, pad + (hout_pad - Hout)),
                            (pad, pad), (0, 0)))            # (N, hout_pad+KH-1, Wp, Cin)
    # Fold the KW taps into channels (kw-major, cin-minor — matches the weight fold).
    x_kw = jnp.concatenate([x_sp[:, :, kw:kw + Wout, :] for kw in range(KW)],
                           axis=-1)                          # (N, hout_pad+KH-1, Wout, KW*Cin)
    if cin_f != cin_fold:
        x_kw = jnp.pad(x_kw, ((0, 0), (0, 0), (0, 0), (0, cin_f - cin_fold)))
    # Pre-block overlapping halo H-strips so a plain Blocked BlockSpec can tile
    # them: VMEM footprint per step is one strip, independent of the image size.
    x_strips = jnp.stack([x_kw[:, i * th: i * th + th_halo] for i in range(n_h)],
                         axis=1)                             # (N, n_h, th_halo, Wout, cin_f)

    # OIHW -> (KH, KW*Cin, Cout), zero-padded to (KH, cin_f, cout_p).
    w_hwio = jnp.transpose(w, (2, 3, 1, 0))                  # (KH, KW, Cin, Cout)
    w_fold = w_hwio.reshape(KH, KW * Cin, Cout)              # kw-major / cin-minor
    w_fold = jnp.pad(w_fold, ((0, 0), (0, cin_f - cin_fold), (0, cout_p - Cout)))

    # Grid: H-strip axis innermost so the weight tile stays resident for the
    # whole H sweep (re-DMA'd only when the Cout tile changes).
    grid = (N, cout_p // tc, n_h)
    flops = 2 * N * Hout * Wout * Cout * KH * KW * Cin
    bytes_accessed = int(x_strips.size * isz + w_fold.size * isz
                         + N * hout_pad * Wout * cout_p * isz)

    out = pl.pallas_call(
        _conv2d_kernel,
        out_shape=jax.ShapeDtypeStruct((N, hout_pad, Wout, cout_p), x.dtype),
        grid=grid,
        in_specs=[
            pl.BlockSpec((1, 1, th_halo, Wout, cin_f),
                         lambda b, c, h: (b, h, 0, 0, 0)),
            pl.BlockSpec((KH, cin_f, tc),
                         lambda b, c, h: (0, 0, c)),
        ],
        out_specs=pl.BlockSpec((1, th, Wout, tc),
                               lambda b, c, h: (b, h, 0, c)),
        compiler_params=pltpu.CompilerParams(
            dimension_semantics=("parallel", "parallel", "parallel"),
            vmem_limit_bytes=vmem_limit),
        cost_estimate=pl.CostEstimate(flops=flops, transcendentals=0,
                                      bytes_accessed=bytes_accessed),
    )(x_strips, w_fold)

    out = out[:, :Hout, :, :Cout]              # drop H / Cout padding
    return jnp.transpose(out, (0, 3, 1, 2))    # NHWC -> NCHW


def mpconv_forward(x, weight, gain=1.0):
    """Forward pass of MPConv (eval mode)."""
    # TODO(synk): training-mode in-place weight re-normalization
    # (self.weight.copy_) is a parameter side effect, not forward compute.
    w = _normalize_weight(weight, gain).astype(x.dtype)
    if w.ndim == 2:
        return _mp_linear(x, w)
    assert w.ndim == 4
    return _mp_conv2d(x, w)


# ----------------------------------------------------------------------------
# Pure-JAX reference (correctness check only)
# ----------------------------------------------------------------------------
def mpconv_reference(x, weight, gain=1.0):
    w = _normalize_weight(weight, gain).astype(x.dtype)
    if w.ndim == 2:
        return x @ w.T
    pad = w.shape[-1] // 2
    return jax.lax.conv_general_dilated(
        x, w,
        window_strides=(1, 1),
        padding=((pad, pad), (pad, pad)),
        dimension_numbers=("NCHW", "OIHW", "NCHW"),
    )


if __name__ == "__main__":
    key = jax.random.PRNGKey(0)
    k_x, k_w, k_x2, k_w2 = jax.random.split(key, 4)

    # --- conv2d branch (4-D weight) ---
    N, Cin, H, W = 2, 4, 16, 16
    Cout, KH, KW = 8, 3, 3
    x = jax.random.normal(k_x, (N, Cin, H, W), dtype=jnp.float32)
    weight = jax.random.normal(k_w, (Cout, Cin, KH, KW), dtype=jnp.float32)

    out = jax.block_until_ready(mpconv_forward(x, weight, gain=1.0))
    ref = mpconv_reference(x, weight, gain=1.0)
    np.testing.assert_allclose(np.asarray(out), np.asarray(ref),
                               rtol=1e-4, atol=1e-4)

    # --- linear branch (2-D weight) ---
    B, Din, Dout = 8, 32, 16
    x2 = jax.random.normal(k_x2, (B, Din), dtype=jnp.float32)
    weight2 = jax.random.normal(k_w2, (Dout, Din), dtype=jnp.float32)

    out2 = jax.block_until_ready(mpconv_forward(x2, weight2, gain=1.0))
    ref2 = mpconv_reference(x2, weight2, gain=1.0)
    np.testing.assert_allclose(np.asarray(out2), np.asarray(ref2),
                               rtol=1e-4, atol=1e-4)

    print("KERNEL_OK")
</pallas_src>

<mosaic_0001>
module attributes {stable_mosaic.version = 11 : i64} {
  func.func @_conv2d_kernel(%arg0: i32, %arg1: i32, %arg2: i32, %arg3: memref<1x1x18x16x128xf32, #tpu.memory_space<vmem>>, %arg4: memref<3x128x128xf32, #tpu.memory_space<vmem>>, %arg5: memref<1x16x16x128xf32, #tpu.memory_space<vmem>>) attributes {dimension_semantics = [#tpu.dimension_semantics<parallel>, #tpu.dimension_semantics<parallel>, #tpu.dimension_semantics<parallel>], iteration_bounds = array<i64: 2, 1, 1>, scalar_prefetch = 0 : i64, scratch_operands = 0 : i64, tpu.core_type = #tpu.core_type<tc>, window_params = [{transform_indices = @transform_0, window_bounds = array<i64: 1, 1, 18, 16, 128>}, {transform_indices = @transform_1, window_bounds = array<i64: 3, 128, 128>}, {transform_indices = @transform_2, window_bounds = array<i64: 1, 16, 16, 128>}]} {
    %c0 = arith.constant 0 : index
    %c0_0 = arith.constant 0 : index
    %c0_1 = arith.constant 0 : index
    %c0_2 = arith.constant 0 : index
    %c0_3 = arith.constant 0 : index
    %0 = vector.load %arg3[%c0, %c0_0, %c0_1, %c0_2, %c0_3] : memref<1x1x18x16x128xf32, #tpu.memory_space<vmem>>, vector<1x1x16x16x128xf32>
    %1 = vector.shape_cast %0 : vector<1x1x16x16x128xf32> to vector<16x16x128xf32>
    %c0_4 = arith.constant 0 : index
    %c0_5 = arith.constant 0 : index
    %c0_6 = arith.constant 0 : index
    %2 = vector.load %arg4[%c0_4, %c0_5, %c0_6] : memref<3x128x128xf32, #tpu.memory_space<vmem>>, vector<1x128x128xf32>
    %3 = vector.shape_cast %2 : vector<1x128x128xf32> to vector<128x128xf32>
    "tpu.trace_start"() <{level = 10 : i32, message = "hwc,cd->hwd"}> : () -> ()
    %cst = arith.constant dense<0.000000e+00> : vector<16x16x128xf32>
    %4 = tpu.matmul %1, %3, %cst {dimension_numbers = #tpu.dot_dimension_numbers<[2], [0], [0, 1], [1], [0, 0, 0, 1, 1, 1], [], []>} : vector<16x16x128xf32>, vector<128x128xf32>, vector<16x16x128xf32> -> vector<16x16x128xf32>
    "tpu.trace_stop"() : () -> ()
    %c0_7 = arith.constant 0 : index
    %c0_8 = arith.constant 0 : index
    %c1 = arith.constant 1 : index
    %c0_9 = arith.constant 0 : index
    %c0_10 = arith.constant 0 : index
    %5 = vector.load %arg3[%c0_7, %c0_8, %c1, %c0_9, %c0_10] : memref<1x1x18x16x128xf32, #tpu.memory_space<vmem>>, vector<1x1x16x16x128xf32>
    %6 = vector.shape_cast %5 : vector<1x1x16x16x128xf32> to vector<16x16x128xf32>
    %c1_11 = arith.constant 1 : index
    %c0_12 = arith.constant 0 : index
    %c0_13 = arith.constant 0 : index
    %7 = vector.load %arg4[%c1_11, %c0_12, %c0_13] : memref<3x128x128xf32, #tpu.memory_space<vmem>>, vector<1x128x128xf32>
    %8 = vector.shape_cast %7 : vector<1x128x128xf32> to vector<128x128xf32>
    "tpu.trace_start"() <{level = 10 : i32, message = "hwc,cd->hwd"}> : () -> ()
    %cst_14 = arith.constant dense<0.000000e+00> : vector<16x16x128xf32>
    %9 = tpu.matmul %6, %8, %cst_14 {dimension_numbers = #tpu.dot_dimension_numbers<[2], [0], [0, 1], [1], [0, 0, 0, 1, 1, 1], [], []>} : vector<16x16x128xf32>, vector<128x128xf32>, vector<16x16x128xf32> -> vector<16x16x128xf32>
    "tpu.trace_stop"() : () -> ()
    %10 = arith.addf %4, %9 : vector<16x16x128xf32>
    %c0_15 = arith.constant 0 : index
    %c0_16 = arith.constant 0 : index
    %c2 = arith.constant 2 : index
    %c0_17 = arith.constant 0 : index
    %c0_18 = arith.constant 0 : index
    %11 = vector.load %arg3[%c0_15, %c0_16, %c2, %c0_17, %c0_18] : memref<1x1x18x16x128xf32, #tpu.memory_space<vmem>>, vector<1x1x16x16x128xf32>
    %12 = vector.shape_cast %11 : vector<1x1x16x16x128xf32> to vector<16x16x128xf32>
    %c2_19 = arith.constant 2 : index
    %c0_20 = arith.constant 0 : index
    %c0_21 = arith.constant 0 : index
    %13 = vector.load %arg4[%c2_19, %c0_20, %c0_21] : memref<3x128x128xf32, #tpu.memory_space<vmem>>, vector<1x128x128xf32>
    %14 = vector.shape_cast %13 : vector<1x128x128xf32> to vector<128x128xf32>
    "tpu.trace_start"() <{level = 10 : i32, message = "hwc,cd->hwd"}> : () -> ()
    %cst_22 = arith.constant dense<0.000000e+00> : vector<16x16x128xf32>
    %15 = tpu.matmul %12, %14, %cst_22 {dimension_numbers = #tpu.dot_dimension_numbers<[2], [0], [0, 1], [1], [0, 0, 0, 1, 1, 1], [], []>} : vector<16x16x128xf32>, vector<128x128xf32>, vector<16x16x128xf32> -> vector<16x16x128xf32>
    "tpu.trace_stop"() : () -> ()
    %16 = arith.addf %10, %15 : vector<16x16x128xf32>
    %c0_23 = arith.constant 0 : index
    %c0_24 = arith.constant 0 : index
    %c0_25 = arith.constant 0 : index
    %c0_26 = arith.constant 0 : index
    %17 = vector.load %arg5[%c0_23, %c0_24, %c0_25, %c0_26] : memref<1x16x16x128xf32, #tpu.memory_space<vmem>>, vector<1x16x16x128xf32>
    %18 = vector.shape_cast %17 : vector<1x16x16x128xf32> to vector<16x16x128xf32>
    %19 = vector.shape_cast %16 : vector<16x16x128xf32> to vector<1x16x16x128xf32>
    tpu.vector_store %arg5[%c0_23, %c0_24, %c0_25, %c0_26], %19 {strides = array<i32>} : memref<1x16x16x128xf32, #tpu.memory_space<vmem>>, vector<1x16x16x128xf32>,
    return
  }
  func.func @transform_0(%arg0: i32, %arg1: i32, %arg2: i32) -> (i32, i32, i32, i32, i32) {
    %c0_i32 = arith.constant 0 : i32
    %c0_i32_0 = arith.constant 0 : i32
    %c0_i32_1 = arith.constant 0 : i32
    %c0_i32_2 = arith.constant 0 : i32
    return %arg0, %arg2, %c0_i32, %c0_i32_0, %c0_i32_1 : i32, i32, i32, i32, i32
  }
  func.func @transform_1(%arg0: i32, %arg1: i32, %arg2: i32) -> (i32, i32, i32) {
    %c0_i32 = arith.constant 0 : i32
    %c0_i32_0 = arith.constant 0 : i32
    %c0_i32_1 = arith.constant 0 : i32
    return %c0_i32, %c0_i32_0, %arg1 : i32, i32, i32
  }
  func.func @transform_2(%arg0: i32, %arg1: i32, %arg2: i32) -> (i32, i32, i32, i32) {
    %c0_i32 = arith.constant 0 : i32
    %c0_i32_0 = arith.constant 0 : i32
    return %arg0, %arg2, %c0_i32, %arg1 : i32, i32, i32, i32
  }
}

</mosaic_0001>

<bundles_post_ra>
// kernel: tpu_custom_call.1
= control target key start
LH: loop header
LB: loop body
LE: loop exit
PB: predicated region body
PF: predicated region fallthrough
CT: control target
= control target key end

     0   :  { %7 = vsyncpa [#allocation3], 0  ;;  %s2512_s0 = inlined_call_operand.hbm [shape: f32[2,1,18,16,128], index: 0, kind: input, shape index: {}]   ;;  %s2513_s1 = inlined_call_operand.hbm [shape: f32[3,128,128], index: 1, kind: input, shape index: {}]   ;;  %s2514_s2 = inlined_call_operand.hbm [shape: f32[2,16,16,128], index: 2, kind: output, shape index: {}]  }
   0x1   :  { %9 = vsyncpa [#allocation3 + $0x1], 0 }
   0x2   :  { %10 = vsyncpa [#allocation6], 0 }
   0x3   :  { %11 = vsyncpa [#allocation4], 0 }
   0x4   :  { %13 = vsyncpa [#allocation4 + $0x1], 0  ;;  %s2107_s9 = smov 0   ;;  %s2109_s10 = smov 0  }
   0x5   :  { %s2111_s11 = smov 0   ;;  %s2113_s12 = smov 0  }
   0x6   :  { %s2115_s13 = smov 0   ;;  %s2117_s14 = smov 0  }
   0x7 LB: > { %s1220_s15 = sadd.s32 4294967295, %s2083_s14   ;;  %s1221_s16 = sadd.s32 4294967294, %s2083_s14   ;;  %s2083_s14 = sphi %s2117_s14, %s19_s14   ;;  %s2079_s13 = sphi %s2115_s13, %s2537_s13   ;;  %s2075_s12 = sphi %s2113_s12, %s2536_s12   ;;  %s2071_s11 = sphi %s2111_s11, %s2535_s11   ;;  %s2067_s10 = sphi %s2109_s10, %s2534_s10   ;;  %s2063_s9 = sphi %s2107_s9, %s2533_s9  }
   0x8   : > { %p60_p0 = scmp.ne.s32.totalorder %s2067_s10, %s2063_s9  ;;  %p2141_p1 = scmp.eq.s32.totalorder %s1220_s15, 0 }
   0x9   : > { %p2145_p2 = scmp.eq.s32.totalorder %s1220_s15, 1  ;;  %p120_p3 = scmp.eq.s32.totalorder %s1221_s16, 1 }
   0xa   : > { %s2519_s17 = scalar_select %p2141_p1, 1, 0 }
   0xb   : > { %s2520_s18 = scalar_select %p2145_p2, 1, 0 }
   0xc   : > { %p2151_p4 = por %p2141_p1, %p60_p0  ;;  %p1222_p5 = scmp.ge.s32.totalorder %s2083_s14, 1 }
   0xd   : > { %p2156_p6 = por %p120_p3, %p60_p0  ;;  %p127_p7 = scmp.lt.s32.totalorder %s2083_s14, 3 }
   0xe   : > { %s2521_s19 = scalar_select %p2151_p4, 1, 0 }
   0xf   : > { %s2522_s20 = scalar_select %p2156_p6, 1, 0 }
  0x10   : > { %p2161_p8 = pnand %p1222_p5, %p127_p7  ;;  %s2085_s22 = smov [#allocation5]  }
  0x11   : > { %s141_s23 = sshll.u32 %s2085_s22, 4  ;;  %s38_s25 = sadd.s32 1, %s2079_s13  ;;  %s142_s23 = int_to_ptr.vmem [resolvable:$true] %s141_s23 }
  0x12   : > { %s2523_s21 = scalar_select %p2161_p8, 1, 0 }
  0x13   : > { %p1870_p9 = pneg %p2161_p8  ;;  %s1939_s28 = scalar_lea.hbm %s2513_s1, 6144 }
  0x14   : > { %p1940_p12 = scmp.ne.s32.totalorder %s2513_s1, %s1939_s28  ;;  %p1946_p5 = scmp.lt.u32.totalorder %s1939_s28, %s2513_s1 }
  0x15   : > { %p2170_p11 = pnand %p1870_p9, %p2141_p1 }
  0x17   : > { %p1941_p13 = pneg %p2170_p11 }
  0x19   : > { %p1942_p0 = pnand %p1941_p13, %p1940_p12 }
  0x1b   : > { %p1943_p3 = pneg %p1942_p0 }
  0x1d   : > { %p1948_p7 = pnand %p1946_p5, %p1943_p3 }
  0x1f   : > { %1951 = shalt.err (!%p1948_p7)
}
  0x20   : > { %s1952_s5 = scalar_lea.vmem %s142_s23, 6144  ;;  %p1960_p1 = scmp.lt.s32.totalorder %s142_s23, %s142_s23 }
  0x21   : > { %p1953_p9 = scmp.ne.s32.totalorder %s142_s23, %s1952_s5  ;;  %p1961_p4 = scmp.lt.s32.totalorder %s1952_s5, %s1952_s5 }
  0x23   : > { %p1955_p10 = pnand %p1953_p9, %p1941_p13  ;;  %p1962_p8 = por %p1961_p4, %p1960_p1 }
  0x25   : > { %p1956_p6 = pneg %p1955_p10 }
  0x27   : > { %p1963_p2 = pnand %p1962_p8, %p1956_p6 }
  0x29   : > { %1966 = shalt.err (!%p1963_p2)
}
  0x2a   : > { %s2086_s6 = smov 128   ;;  %s2087_s7 = smov 8  }
  0x2b   : > { %1873 = dma.hbm_to_vmem [thread:$0]  (!%p2170_p11), %s2513_s1, 6144, %s142_s23, [#allocation6], %s2086_s6, %s2086_s6, %s2087_s7  }
  0x2c   : > { %p40_p1 = scmp.ge.s32.totalorder %s38_s25, 2  ;;  %s47_s16 = sadd.s32 1, %s2071_s11 }
  0x2d   : > { %p54_p2 = scmp.ne.s32.totalorder %s2071_s11, %s2067_s10  ;;  %p55_p4 = scmp.eq.s32.totalorder %s2083_s14, 0 }
  0x2e   : > { %s2539_s25 = smov (%p40_p1, %s38_s25), 0  ;;  %p2525_p8 = scmp.ne.s32.totalorder %s2520_s18, 0 }
  0x2f   : > { %p56_p6 = por %p55_p4, %p54_p2  ;;  %s42_s24 = ssub.s32 %s2079_s13, %s2539_s25 }
  0x30   : > { %p2202_p10 = por %p2525_p8, %p54_p2  ;;  %p1883_p12 = scmp.lt.s32.totalorder %s2083_s14, 2 }
  0x31   : > { %p45_p13 = scmp.eq.s32.totalorder %s42_s24, 0  ;;  %s155_s26 = sand.u32 1, %s2071_s11  }
  0x32   : > { %s1859_s27 = smul.u32 288, %s155_s26  ;;  %p2214_p11 = pnand %p1883_p12, %p56_p6 }
  0x33   : > { %s2211_s28 = scalar_select %p45_p13, %s2071_s11, %s47_s16  }
  0x34   : > { %s1860_s23 = smul.u32 4608, %s2079_s13  ;;  %s159_s29 = scalar_lea.vmem [#allocation2], %s1859_s27 }
  0x35   : > { %s168_s30 = sshll.u32 %s159_s29, 4  ;;  %s2225_s8 = scalar_lea.sflag [#allocation3], %s155_s26  ;;  %s2223_s30 = int_to_ptr.vmem [resolvable:$true] %s168_s30 }
  0x36   : > { %s2221_s5 = scalar_lea.hbm %s2512_s0, %s1860_s23  ;;  %p1969_p3 = pneg %p2214_p11 }
  0x37   : > { %s1967_s15 = scalar_lea.hbm %s2221_s5, 4608  ;;  %s1972_s27 = scalar_lea.hbm %s2512_s0, 9216 }
  0x38   : > { %p1968_p0 = scmp.ne.s32.totalorder %s2221_s5, %s1967_s15  ;;  %p1973_p9 = scmp.lt.u32.totalorder %s2221_s5, %s2512_s0 }
  0x39   : > { %p1974_p1 = scmp.lt.u32.totalorder %s1972_s27, %s1967_s15  ;;  %p1976_p4 = scmp.lt.u32.totalorder %s1967_s15, %s2221_s5 }
  0x3a   : > { %p1970_p5 = pnand %p1969_p3, %p1968_p0 }
  0x3b   : > { %p1975_p2 = por %p1974_p1, %p1973_p9 }
  0x3c   : > { %p1971_p7 = pneg %p1970_p5 }
  0x3d   : > { %p1977_p6 = por %p1976_p4, %p1975_p2 }
  0x3f   : > { %p1978_p8 = pnand %p1977_p6, %p1971_p7 }
  0x41   : > { %1981 = shalt.err (!%p1978_p8)
}
  0x42   : > { %s1982_s26 = scalar_lea.vmem %s2223_s30, 4608  ;;  %s2088_s4 = smov [#allocation2]  }
  0x43   : > { %p1983_p12 = scmp.ne.s32.totalorder %s2223_s30, %s1982_s26  ;;  %s1987_s18 = sshll.u32 %s2088_s4, 4  ;;  %s1988_s18 = int_to_ptr.vmem [resolvable:$false] %s1987_s18 }
  0x44   : > { %s1989_s16 = scalar_lea.vmem %s1988_s18, 9216  ;;  %p1990_p5 = scmp.lt.s32.totalorder %s2223_s30, %s1988_s18 }
  0x45   : > { %p1985_p13 = pnand %p1983_p12, %p1969_p3  ;;  %p1991_p9 = scmp.lt.s32.totalorder %s1989_s16, %s1982_s26 }
  0x47   : > { %p1986_p0 = pneg %p1985_p13  ;;  %p1992_p1 = por %p1991_p9, %p1990_p5 }
  0x49   : > { %p1993_p2 = pnand %p1992_p1, %p1986_p0 }
  0x4b   : > { %1996 = shalt.err (!%p1993_p2)
}
  0x4c   : > { %1877 = dma.hbm_to_vmem [thread:$0]  (!%p2214_p11), %s2221_s5, 4608, %s2223_s30, %s2225_s8, %s2086_s6, %s2086_s6, %s2087_s7  }
  0x4d   : > { %p2528_p3 = scmp.ne.s32.totalorder %s2523_s21, 0 }
  0x4e   : > { %s2259_s15 = sand.u32 (!%p2528_p3), 1, %s2067_s10   ;;  %p2529_p7 = scmp.ne.s32.totalorder (!%p2528_p3), %s2521_s19, 0 }
  0x4f   : > { %180 = sbr.rel (%p2528_p3) target bundleno = 448 (0x1c0), region = 28  ;;  %s183_s27 = scalar_lea.sflag (!%p2528_p3), [#allocation3], %s2259_s15 }
  0x50   : > { %s1861_s24 = smul.u32 (!%p2528_p3), 288, %s2259_s15 }
  0x52   : > { %s2263_s23 = scalar_lea.vmem (!%p2528_p3), [#allocation2], %s1861_s24 }
  0x56   : > { %2050 = dma.done.wait (%p2529_p7), %s183_s27, 4608  }
  0x57   : > { %2052 = vsyncadd (%p2529_p7), %s183_s27, 4294962688  ;;  %p2530_p11 = scmp.ne.s32.totalorder %s2519_s17, 0 }
  0x59   : > { %2054 = dma.done.wait (%p2530_p11), [#allocation6], 6144  }
  0x5a   : > { %2056 = vsyncadd (%p2530_p11), [#allocation6], 4294961152  ;;  %v294_v0 = vld [vmem:[#allocation5 + $0x80] sm:$0xff]  ;;  %v295_v1 = vld [vmem:[#allocation5 + $0x88] sm:$0xff]  ;;  %s1228_s17 = sshll.u32 %s2259_s15, 8  ;;  %s1298_s21 = sshll.u32 %s2075_s12, 12 }
  0x5b   : > { %v244_v2 = vld [vmem:[#allocation5] sm:$0xff]  ;;  %v1683_v3 = vpack.c.bf16 %v295_v1, %v294_v0  ;;  %v245_v4 = vld [vmem:[#allocation5 + $0x8] sm:$0xff]  ;;  %v296_v5 = vld [vmem:[#allocation5 + $0x90] sm:$0xff]  ;;  %s2422_s19 = scalar_lea.vmem [#allocation7], %s1228_s17  ;;  %s2459_s3 = scalar_lea.hbm %s2514_s2, %s1298_s21 }
  0x5c   : > { %v297_v6 = vld [vmem:[#allocation5 + $0x98] sm:$0xff]  ;;  %v2273_v7 = vpack.c.bf16 %v245_v4, %v244_v2  ;;  %v246_v9 = vld [vmem:[#allocation5 + $0x10] sm:$0xff]  ;;  %v298_v11 = vld [vmem:[#allocation5 + $0xa0] sm:$0xff]  ;;  %s1117_s6 = sshll.u32 %s2422_s19, 4  ;;  %s1100_s12 = scalar_lea.sflag [#allocation4], %s2259_s15  ;;  %s2461_s6 = int_to_ptr.vmem [resolvable:$true] %s1117_s6 }
  0x5d   : > { %v1687_v8 = vpack.c.bf16 %v297_v6, %v296_v5  ;;  %v247_v10 = vld [vmem:[#allocation5 + $0x18] sm:$0xff]  ;;  %1684 = vmatprep.subr.bf16.mxu1 %v1683_v3  ;;  %v299_v13 = vld [vmem:[#allocation5 + $0xa8] sm:$0xff]  ;;  %v248_v14 = vld [vmem:[#allocation5 + $0x20] sm:$0xff]  ;;  %s1997_s5 = scalar_lea.vmem %s2461_s6, 4096  ;;  %s2089_s8 = smov [#allocation7]  }
  0x5e   : > { %v2275_v12 = vpack.c.bf16 %v247_v10, %v246_v9  ;;  %v249_v15 = vld [vmem:[#allocation5 + $0x28] sm:$0xff]  ;;  %1716 = vmatprep.subr.bf16.mxu0 %v2273_v7  ;;  %1686 = vmatpush3.bf16.msra.mxu1 %v1683_v3  ;;  %v1691_v16 = vpack.c.bf16 %v299_v13, %v298_v11  ;;  %v300_v18 = vld [vmem:[#allocation5 + $0xb0] sm:$0xff]  ;;  %v301_v19 = vld [vmem:[#allocation5 + $0xb8] sm:$0xff]  ;;  %p1998_p4 = scmp.ne.s32.totalorder %s2461_s6, %s1997_s5  ;;  %s2001_s29 = sshll.u32 %s2089_s8, 4  ;;  %s2002_s29 = int_to_ptr.vmem [resolvable:$false] %s2001_s29 }
  0x5f   : > { %1718 = vmatpush3.bf16.msra.mxu0 %v2273_v7  ;;  %1688 = vmatprep.subr.bf16.mxu1 %v1687_v8  ;;  %v2280_v17 = vpack.c.bf16 %v249_v15, %v248_v14  ;;  %v250_v20 = vld [vmem:[#allocation5 + $0x30] sm:$0xff]  ;;  %v251_v21 = vld [vmem:[#allocation5 + $0x38] sm:$0xff]  ;;  %v1695_v22 = vpack.c.bf16 %v301_v19, %v300_v18  ;;  %v302_v24 = vld [vmem:[#allocation5 + $0xc0] sm:$0xff]  ;;  %s2003_s26 = scalar_lea.vmem %s2002_s29, 8192  ;;  %p2004_p12 = scmp.lt.s32.totalorder %s2461_s6, %s2002_s29 }
  0x60   : > { %1720 = vmatprep.subr.bf16.mxu0 %v2275_v12  ;;  %v2284_v23 = vpack.c.bf16 %v251_v21, %v250_v20  ;;  %v303_v25 = vld [vmem:[#allocation5 + $0xc8] sm:$0xff]  ;;  %v2287_v26 = vld [vmem:[%s2263_s23 + $0x10] sm:$0xff]  ;;  %v252_v27 = vld [vmem:[#allocation5 + $0x40] sm:$0xff]  ;;  %p1999_p6 = pnand %p1998_p4, %p2202_p10  ;;  %p2005_p13 = scmp.lt.s32.totalorder %s2003_s26, %s1997_s5 }
  0x61   : > { %v253_v28 = vld [vmem:[#allocation5 + $0x48] sm:$0xff]  ;;  %1475 = vmatprep.mubr.f32.mxu1 %v2287_v26  ;;  %v212_v29 = vld [vmem:[%s2263_s23] sm:$0xff]  ;;  %v1699_v30 = vpack.c.bf16 %v303_v25, %v302_v24  ;;  %v304_v32 = vld [vmem:[#allocation5 + $0xd0] sm:$0xff] }
  0x62   : > { %1690 = vmatpush3.bf16.msra.mxu1 %v1687_v8  ;;  %1555 = vmatprep.mubr.f32.mxu0 %v212_v29  ;;  %v2293_v31 = vpack.c.bf16 %v253_v28, %v252_v27  ;;  %v305_v33 = vld [vmem:[#allocation5 + $0xd8] sm:$0xff]  ;;  %v254_v34 = vld [vmem:[#allocation5 + $0x50] sm:$0xff]  ;;  %v306_v38 = vld [vmem:[#allocation5 + $0xe0] sm:$0xff]  ;;  %p2000_p8 = pneg %p1999_p6  ;;  %p2006_p0 = por %p2005_p13, %p2004_p12 }
  0x63   : > { %1722 = vmatpush3.bf16.msra.mxu0 %v2275_v12  ;;  %1692 = vmatprep.subr.bf16.mxu1 %v1691_v16  ;;  %v255_v35 = vld [vmem:[#allocation5 + $0x58] sm:$0xff]  ;;  %v1703_v36 = vpack.c.bf16 %v305_v33, %v304_v32  ;;  %v307_v39 = vld [vmem:[#allocation5 + $0xe8] sm:$0xff]  ;;  %v256_v40 = vld [vmem:[#allocation5 + $0x60] sm:$0xff] }
  0x64   : > { %1724 = vmatprep.subr.bf16.mxu0 %v2280_v17  ;;  %v2297_v37 = vpack.c.bf16 %v255_v35, %v254_v34  ;;  %v257_v41 = vld [vmem:[#allocation5 + $0x68] sm:$0xff]  ;;  %v1707_v42 = vpack.c.bf16 %v307_v39, %v306_v38  ;;  %v308_v44 = vld [vmem:[#allocation5 + $0xf0] sm:$0xff]  ;;  %v309_v45 = vld [vmem:[#allocation5 + $0xf8] sm:$0xff]  ;;  %p2007_p5 = pnand %p2006_p0, %p2000_p8 }
  0x65   : > { %v2301_v43 = vpack.c.bf16 %v257_v41, %v256_v40  ;;  %v258_v46 = vld [vmem:[#allocation5 + $0x70] sm:$0xff]  ;;  %v259_v47 = vld [vmem:[#allocation5 + $0x78] sm:$0xff]  ;;  %v1711_v48 = vpack.c.bf16 %v309_v45, %v308_v44  ;;  %v794_v50 = vld [vmem:[#allocation5 + $0x100] sm:$0xff] }
  0x66   : > { %1694 = vmatpush3.bf16.msra.mxu1 %v1691_v16  ;;  %v2305_v49 = vpack.c.bf16 %v259_v47, %v258_v46  ;;  %v795_v51 = vld [vmem:[#allocation5 + $0x108] sm:$0xff]  ;;  %v796_v53 = vld [vmem:[#allocation5 + $0x110] sm:$0xff]  ;;  %v797_v54 = vld [vmem:[#allocation5 + $0x118] sm:$0xff] }
  0x67   : > { %1726 = vmatpush3.bf16.msra.mxu0 %v2280_v17  ;;  %1696 = vmatprep.subr.bf16.mxu1 %v1695_v22  ;;  %v1747_v52 = vpack.c.bf16 %v795_v51, %v794_v50  ;;  %v1230_v55 = vld [vmem:[%s2263_s23 + $0x18] sm:$0xff]  ;;  %v213_v56 = vld [vmem:[%s2263_s23 + $0x8] sm:$0xff]  ;;  %v2314_v57 = vld [vmem:[%s2263_s23 + $0x20] sm:$0xff]  ;;  %v1751_v58 = vpack.c.bf16 %v797_v54, %v796_v53 }
  0x68   : > { %1728 = vmatprep.subr.bf16.mxu0 %v2284_v23  ;;  %v798_v59 = vld [vmem:[#allocation5 + $0x120] sm:$0xff]  ;;  %v799_v60 = vld [vmem:[#allocation5 + $0x128] sm:$0xff]  ;;  %v2322_v62 = vld [vmem:[%s2263_s23 + $0x30] sm:$0xff] }
  0x69   : > { %v2318_v61 = vld [vmem:[%s2263_s23 + $0x28] sm:$0xff]  ;;  %v1755_v63 = vpack.c.bf16 %v799_v60, %v798_v59  ;;  %v800_v0 = vld [vmem:[#allocation5 + $0x130] sm:$0xff]  ;;  %v801_v1 = vld [vmem:[#allocation5 + $0x138] sm:$0xff] }
  0x6a   : > { %1698 = vmatpush3.bf16.msra.mxu1 %v1695_v22  ;;  %v2329_v2 = vld [vmem:[%s2263_s23 + $0x38] sm:$0xff]  ;;  %v2333_v3 = vld [vmem:[%s2263_s23 + $0x40] sm:$0xff]  ;;  %v1759_v4 = vpack.c.bf16 %v801_v1, %v800_v0  ;;  %v803_v6 = vld [vmem:[#allocation5 + $0x148] sm:$0xff] }
  0x6b   : > { %1730 = vmatpush3.bf16.msra.mxu0 %v2284_v23  ;;  %1700 = vmatprep.subr.bf16.mxu1 %v1699_v30  ;;  %v802_v5 = vld [vmem:[#allocation5 + $0x140] sm:$0xff]  ;;  %v2345_v8 = vld [vmem:[%s2263_s23 + $0x50] sm:$0xff]  ;;  %v805_v11 = vld [vmem:[#allocation5 + $0x158] sm:$0xff] }
  0x6c   : > { %1732 = vmatprep.subr.bf16.mxu0 %v2293_v31  ;;  %v1763_v9 = vpack.c.bf16 %v803_v6, %v802_v5  ;;  %v804_v10 = vld [vmem:[#allocation5 + $0x150] sm:$0xff]  ;;  %v2357_v13 = vld [vmem:[%s2263_s23 + $0x60] sm:$0xff]  ;;  %v807_v16 = vld [vmem:[#allocation5 + $0x168] sm:$0xff] }
  0x6d   : > { %v1767_v14 = vpack.c.bf16 %v805_v11, %v804_v10  ;;  %v806_v15 = vld [vmem:[#allocation5 + $0x160] sm:$0xff]  ;;  %v2369_v18 = vld [vmem:[%s2263_s23 + $0x70] sm:$0xff]  ;;  %v809_v21 = vld [vmem:[#allocation5 + $0x178] sm:$0xff] }
  0x6e   : > { %1702 = vmatpush3.bf16.msra.mxu1 %v1699_v30  ;;  %v1771_v19 = vpack.c.bf16 %v807_v16, %v806_v15  ;;  %v808_v20 = vld [vmem:[#allocation5 + $0x170] sm:$0xff]  ;;  %v1242_v22 = vld [vmem:[%s2263_s23 + $0x78] sm:$0xff]  ;;  %v1244_v25 = vld [vmem:[%s2263_s23 + $0x88] sm:$0xff] }
  0x6f   : > { %1734 = vmatpush3.bf16.msra.mxu0 %v2293_v31  ;;  %1704 = vmatprep.subr.bf16.mxu1 %v1703_v36  ;;  %v1775_v24 = vpack.c.bf16 %v809_v21, %v808_v20  ;;  %v1246_v27 = vld [vmem:[%s2263_s23 + $0x98] sm:$0xff]  ;;  %v1247_v28 = vld [vmem:[%s2263_s23 + $0xa0] sm:$0xff]  ;;  %v1248_v29 = vld [vmem:[%s2263_s23 + $0xa8] sm:$0xff] }
  0x70   : > { %1736 = vmatprep.subr.bf16.mxu0 %v2297_v37  ;;  %v1249_v30 = vld [vmem:[%s2263_s23 + $0xb0] sm:$0xff]  ;;  %v1251_v32 = vld [vmem:[%s2263_s23 + $0xc0] sm:$0xff]  ;;  %v1252_v33 = vld [vmem:[%s2263_s23 + $0xc8] sm:$0xff] }
  0x71   : > { %v1253_v34 = vld [vmem:[%s2263_s23 + $0xd0] sm:$0xff]  ;;  %v1254_v35 = vld [vmem:[%s2263_s23 + $0xd8] sm:$0xff]  ;;  %v1259_v40 = vld [vmem:[%s2263_s23 + $0x100] sm:$0xff] }
  0x72   : > { %1706 = vmatpush3.bf16.msra.mxu1 %v1703_v36  ;;  %v1255_v36 = vld [vmem:[%s2263_s23 + $0xe0] sm:$0xff]  ;;  %v1257_v38 = vld [vmem:[%s2263_s23 + $0xf0] sm:$0xff]  ;;  %v1258_v39 = vld [vmem:[%s2263_s23 + $0xf8] sm:$0xff] }
  0x73   : > { %1738 = vmatpush3.bf16.msra.mxu0 %v2297_v37  ;;  %1708 = vmatprep.subr.bf16.mxu1 %v1707_v42  ;;  %v1260_v41 = vld [vmem:[%s2263_s23 + $0x108] sm:$0xff] }
  0x74   : > { %1740 = vmatprep.subr.bf16.mxu0 %v2301_v43 }
  0x76   : > { %1710 = vmatpush3.bf16.msra.mxu1 %v1707_v42  ;;  %v1291_v42 = vld [vmem:[%s2263_s23 + $0x110] sm:$0xff] }
  0x77   : > { %1742 = vmatpush3.bf16.msra.mxu0 %v2301_v43  ;;  %1712 = vmatprep.subr.bf16.mxu1 %v1711_v48 }
  0x78   : > { %1744 = vmatprep.subr.bf16.mxu0 %v2305_v49 }
  0x7a   : > { %1714 = vmatpush3.bf16.msra.mxu1 %v1711_v48 }
  0x7b   : > { %1746 = vmatpush3.bf16.msra.mxu0 %v2305_v49  ;;  %1779 = vmatprep.subr.bf16.mxu1 %v2273_v7 }
  0x7c   : > { %1748 = vmatprep.subr.bf16.mxu0 %v1747_v52 }
  0x7d   : > { %1476 = vmatmul.mubr.f32.vlgmr.msra.gmra.mrb[0].mxu1 %v1230_v55 }
  0x7e   : > { %1556 = vmatmul.mubr.f32.vlgmr.msra.gmra.mrb[0].mxu0 %v213_v56  ;;  %1787 = vmatpush3.bf16.msra.mxu1 %v2273_v7  ;;  %v2341_v7 = vld [vmem:[%s2263_s23 + $0x48] sm:$0xff] }
  0x7f   : > { %1750 = vmatpush3.bf16.msra.mxu0 %v1747_v52  ;;  %1478 = vmatprep.mubr.f32.mxu1 %v2314_v57 }
  0x80   : > { %1558 = vmatprep.mubr.f32.mxu0 %v2287_v26  ;;  %1752 = vmatprep.subr.bf16.mxu0 %v1751_v58  ;;  %v1245_v26 = vld [vmem:[%s2263_s23 + $0x90] sm:$0xff] }
  0x81   : > { %1479 = vmatmul.mubr.f32.gmra.mrb[2].mxu1 %v2318_v61  ;;  %1780 = vmatprep.subr.bf16.mxu1 %v2275_v12 }
  0x82   : > { %1559 = vmatmul.mubr.f32.gmra.mrb[2].mxu0 %v1230_v55  ;;  %1481 = vmatprep.mubr.f32.mxu1 %v2322_v62 }
  0x83   : > { %1754 = vmatpush3.bf16.msra.mxu0 %v1751_v58  ;;  %1561 = vmatprep.mubr.f32.mxu0 %v2314_v57 }
  0x84   : > { %1756 = vmatprep.subr.bf16.mxu0 %v1755_v63  ;;  %1788 = vmatpush3.bf16.msra.mxu1 %v2275_v12  ;;  %v2353_v12 = vld [vmem:[%s2263_s23 + $0x58] sm:$0xff] }
  0x85   : > { %1482 = vmatmul.mubr.f32.gmra.mrb[4].mxu1 %v2329_v2  ;;  %1781 = vmatprep.subr.bf16.mxu1 %v2280_v17 }
  0x86   : > { %1562 = vmatmul.mubr.f32.gmra.mrb[4].mxu0 %v2318_v61  ;;  %1484 = vmatprep.mubr.f32.mxu1 %v2333_v3 }
  0x87   : > { %1758 = vmatpush3.bf16.msra.mxu0 %v1755_v63  ;;  %1564 = vmatprep.mubr.f32.mxu0 %v2322_v62 }
  0x88   : > { %1760 = vmatprep.subr.bf16.mxu0 %v1759_v4  ;;  %1789 = vmatpush3.bf16.msra.mxu1 %v2280_v17  ;;  %v2365_v17 = vld [vmem:[%s2263_s23 + $0x68] sm:$0xff] }
  0x89   : > { %1485 = vmatmul.mubr.f32.gmra.mrb[6].mxu1 %v2341_v7  ;;  %1782 = vmatprep.subr.bf16.mxu1 %v2284_v23 }
  0x8a   : > { %1565 = vmatmul.mubr.f32.gmra.mrb[6].mxu0 %v2329_v2  ;;  %1487 = vmatprep.mubr.f32.mxu1 %v2345_v8 }
  0x8b   : > { %1762 = vmatpush3.bf16.msra.mxu0 %v1759_v4  ;;  %1567 = vmatprep.mubr.f32.mxu0 %v2333_v3 }
  0x8c   : > { %1764 = vmatprep.subr.bf16.mxu0 %v1763_v9  ;;  %1790 = vmatpush3.bf16.msra.mxu1 %v2284_v23  ;;  %v2379_v23 = vld [vmem:[%s2263_s23 + $0x80] sm:$0xff] }
  0x8d   : > { %1488 = vmatmul.mubr.f32.gmra.mrb[8].mxu1 %v2353_v12  ;;  %1783 = vmatprep.subr.bf16.mxu1 %v2293_v31 }
  0x8e   : > { %1568 = vmatmul.mubr.f32.gmra.mrb[8].mxu0 %v2341_v7  ;;  %1490 = vmatprep.mubr.f32.mxu1 %v2357_v13 }
  0x8f   : > { %1766 = vmatpush3.bf16.msra.mxu0 %v1763_v9  ;;  %1570 = vmatprep.mubr.f32.mxu0 %v2345_v8 }
  0x90   : > { %1768 = vmatprep.subr.bf16.mxu0 %v1767_v14  ;;  %1791 = vmatpush3.bf16.msra.mxu1 %v2293_v31  ;;  %v1250_v31 = vld [vmem:[%s2263_s23 + $0xb8] sm:$0xff] }
  0x91   : > { %1491 = vmatmul.mubr.f32.gmra.mrb[10].mxu1 %v2365_v17  ;;  %1784 = vmatprep.subr.bf16.mxu1 %v2297_v37 }
  0x92   : > { %1571 = vmatmul.mubr.f32.gmra.mrb[10].mxu0 %v2353_v12  ;;  %1493 = vmatprep.mubr.f32.mxu1 %v2369_v18 }
  0x93   : > { %1770 = vmatpush3.bf16.msra.mxu0 %v1767_v14  ;;  %1573 = vmatprep.mubr.f32.mxu0 %v2357_v13 }
  0x94   : > { %1772 = vmatprep.subr.bf16.mxu0 %v1771_v19  ;;  %1792 = vmatpush3.bf16.msra.mxu1 %v2297_v37  ;;  %v1256_v37 = vld [vmem:[%s2263_s23 + $0xe8] sm:$0xff] }
  0x95   : > { %1494 = vmatmul.mubr.f32.gmra.mrb[12].mxu1 %v1242_v22  ;;  %1785 = vmatprep.subr.bf16.mxu1 %v2301_v43 }
  0x96   : > { %1574 = vmatmul.mubr.f32.gmra.mrb[12].mxu0 %v2365_v17  ;;  %1496 = vmatprep.mubr.f32.mxu1 %v2379_v23 }
  0x97   : > { %1774 = vmatpush3.bf16.msra.mxu0 %v1771_v19  ;;  %1576 = vmatprep.mubr.f32.mxu0 %v2369_v18 }
  0x98   : > { %1776 = vmatprep.subr.bf16.mxu0 %v1775_v24  ;;  %1793 = vmatpush3.bf16.msra.mxu1 %v2301_v43  ;;  %v1292_v43 = vld [vmem:[%s2263_s23 + $0x118] sm:$0xff] }
  0x99   : > { %1497 = vmatmul.mubr.f32.gmra.mrb[14].mxu1 %v1244_v25  ;;  %1786 = vmatprep.subr.bf16.mxu1 %v2305_v49 }
  0x9a   : > { %1577 = vmatmul.mubr.f32.gmra.mrb[14].mxu0 %v1242_v22  ;;  %1499 = vmatprep.mubr.f32.mxu1 %v1245_v26 }
  0x9b   : > { %1778 = vmatpush3.bf16.msra.mxu0 %v1775_v24  ;;  %1635 = vmatprep.mubr.f32.mxu0 %v2314_v57 }
  0x9c   : > { %1794 = vmatpush3.bf16.msra.mxu1 %v2305_v49 }
  0x9d   : > { %1500 = vmatmul.mubr.f32.gmra.mrb[16].mxu1 %v1246_v27 }
  0x9e   : > { %1636 = vmatmul.mubr.f32.vlgmr.msra.gmra.mrb[0].mxu0 %v2318_v61  ;;  %1502 = vmatprep.mubr.f32.mxu1 %v1247_v28 }
  0x9f   : > { %1638 = vmatprep.mubr.f32.mxu0 %v2322_v62 }
  0xa1   : > { %1503 = vmatmul.mubr.f32.gmra.mrb[18].mxu1 %v1248_v29 }
  0xa2   : > { %1639 = vmatmul.mubr.f32.gmra.mrb[2].mxu0 %v2329_v2  ;;  %1505 = vmatprep.mubr.f32.mxu1 %v1249_v30 }
  0xa3   : > { %1641 = vmatprep.mubr.f32.mxu0 %v2333_v3 }
  0xa5   : > { %1506 = vmatmul.mubr.f32.gmra.mrb[20].mxu1 %v1250_v31 }
  0xa6   : > { %1642 = vmatmul.mubr.f32.gmra.mrb[4].mxu0 %v2341_v7  ;;  %1508 = vmatprep.mubr.f32.mxu1 %v1251_v32 }
  0xa7   : > { %1644 = vmatprep.mubr.f32.mxu0 %v2345_v8 }
  0xa9   : > { %1509 = vmatmul.mubr.f32.gmra.mrb[22].mxu1 %v1252_v33 }
  0xaa   : > { %1645 = vmatmul.mubr.f32.gmra.mrb[6].mxu0 %v2353_v12  ;;  %1511 = vmatprep.mubr.f32.mxu1 %v1253_v34 }
  0xab   : > { %1647 = vmatprep.mubr.f32.mxu0 %v2357_v13 }
  0xad   : > { %1512 = vmatmul.mubr.f32.gmra.mrb[24].mxu1 %v1254_v35 }
  0xae   : > { %1648 = vmatmul.mubr.f32.gmra.mrb[8].mxu0 %v2365_v17  ;;  %1514 = vmatprep.mubr.f32.mxu1 %v1255_v36 }
  0xaf   : > { %1650 = vmatprep.mubr.f32.mxu0 %v2369_v18 }
  0xb1   : > { %1515 = vmatmul.mubr.f32.gmra.mrb[26].mxu1 %v1256_v37 }
  0xb2   : > { %1651 = vmatmul.mubr.f32.gmra.mrb[10].mxu0 %v1242_v22  ;;  %1517 = vmatprep.mubr.f32.mxu1 %v1257_v38 }
  0xb3   : > { %1653 = vmatprep.mubr.f32.mxu0 %v2379_v23 }
  0xb5   : > { %1518 = vmatmul.mubr.f32.gmra.mrb[28].mxu1 %v1258_v39 }
  0xb6   : > { %1654 = vmatmul.mubr.f32.gmra.mrb[12].mxu0 %v1244_v25  ;;  %1520 = vmatprep.mubr.f32.mxu1 %v1259_v40 }
  0xb7   : > { %1656 = vmatprep.mubr.f32.mxu0 %v1245_v26 }
  0xb9   : > { %1521 = vmatmul.mubr.f32.gmra.mrb[30].mxu1 %v1260_v41 }
  0xba   : > { %1657 = vmatmul.mubr.f32.gmra.mrb[14].mxu0 %v1246_v27  ;;  %1579 = vmatprep.mubr.f32.mxu1 %v2379_v23 }
  0xbb   : > { %1659 = vmatprep.mubr.f32.mxu0 %v1247_v28 }
  0xbd   : > { %1580 = vmatmul.mubr.f32.vlgmr.msra.gmra.mrb[16].mxu1 %v1244_v25 }
  0xbe   : > { %1660 = vmatmul.mubr.f32.gmra.mrb[16].mxu0 %v1248_v29  ;;  %1582 = vmatprep.mubr.f32.mxu1 %v1245_v26 }
  0xbf   : > { %1662 = vmatprep.mubr.f32.mxu0 %v1249_v30 }
  0xc1   : > { %1583 = vmatmul.mubr.f32.gmra.mrb[18].mxu1 %v1246_v27 }
  0xc2   : > { %1663 = vmatmul.mubr.f32.gmra.mrb[18].mxu0 %v1250_v31  ;;  %1585 = vmatprep.mubr.f32.mxu1 %v1247_v28 }
  0xc3   : > { %1665 = vmatprep.mubr.f32.mxu0 %v1251_v32 }
  0xc5   : > { %1586 = vmatmul.mubr.f32.gmra.mrb[20].mxu1 %v1248_v29 }
  0xc6   : > { %1666 = vmatmul.mubr.f32.gmra.mrb[20].mxu0 %v1252_v33  ;;  %1588 = vmatprep.mubr.f32.mxu1 %v1249_v30 }
  0xc7   : > { %1668 = vmatprep.mubr.f32.mxu0 %v1253_v34 }
  0xc9   : > { %1589 = vmatmul.mubr.f32.gmra.mrb[22].mxu1 %v1250_v31 }
  0xca   : > { %1669 = vmatmul.mubr.f32.gmra.mrb[22].mxu0 %v1254_v35  ;;  %1591 = vmatprep.mubr.f32.mxu1 %v1251_v32 }
  0xcb   : > { %1671 = vmatprep.mubr.f32.mxu0 %v1255_v36 }
  0xcd   : > { %1592 = vmatmul.mubr.f32.gmra.mrb[24].mxu1 %v1252_v33 }
  0xce   : > { %1672 = vmatmul.mubr.f32.gmra.mrb[24].mxu0 %v1256_v37  ;;  %1594 = vmatprep.mubr.f32.mxu1 %v1253_v34 }
  0xcf   : > { %1674 = vmatprep.mubr.f32.mxu0 %v1257_v38 }
  0xd1   : > { %1595 = vmatmul.mubr.f32.gmra.mrb[26].mxu1 %v1254_v35 }
  0xd2   : > { %1675 = vmatmul.mubr.f32.gmra.mrb[26].mxu0 %v1258_v39  ;;  %1597 = vmatprep.mubr.f32.mxu1 %v1255_v36 }
  0xd3   : > { %1677 = vmatprep.mubr.f32.mxu0 %v1259_v40 }
  0xd5   : > { %1598 = vmatmul.mubr.f32.gmra.mrb[28].mxu1 %v1256_v37 }
  0xd6   : > { %1678 = vmatmul.mubr.f32.gmra.mrb[28].mxu0 %v1260_v41  ;;  %1600 = vmatprep.mubr.f32.mxu1 %v1257_v38 }
  0xd7   : > { %1680 = vmatprep.mubr.f32.mxu0 %v1291_v42 }
  0xd9   : > { %1601 = vmatmul.mubr.f32.gmra.mrb[30].mxu1 %v1258_v39 }
  0xda   : > { %1681 = vmatmul.mubr.f32.gmra.mrb[30].mxu0 %v1292_v43 }
 0x150   : > { %v1477_v44 = vpop.f32.mrb[0].mxu1 }
 0x151   : > { %v376_v45 = vpop.f32.mrb[1].mxu1 }
 0x154   : > { %v1480_v46 = vpop.f32.mrb[2].mxu1 }
 0x155   : > { %v386_v47 = vpop.f32.mrb[3].mxu1 }
 0x158   : > { %v1483_v48 = vpop.f32.mrb[4].mxu1 }
 0x159   : > { %v396_v49 = vpop.f32.mrb[5].mxu1 }
 0x15c   : > { %v1486_v50 = vpop.f32.mrb[6].mxu1 }
 0x15d   : > { %v406_v51 = vpop.f32.mrb[7].mxu1 }
 0x160   : > { %v1489_v52 = vpop.f32.mrb[8].mxu1 }
 0x161   : > { %v416_v53 = vpop.f32.mrb[9].mxu1 }
 0x164   : > { %v1492_v54 = vpop.f32.mrb[10].mxu1 }
 0x165   : > { %v426_v55 = vpop.f32.mrb[11].mxu1 }
 0x168   : > { %v1495_v56 = vpop.f32.mrb[12].mxu1 }
 0x169   : > { %v436_v57 = vpop.f32.mrb[13].mxu1 }
 0x16c   : > { %v1498_v58 = vpop.f32.mrb[14].mxu1 }
 0x16d   : > { %v446_v59 = vpop.f32.mrb[15].mxu1 }
 0x171   : > { %v1637_v60 = vpop.f32.mrb[0].mxu0 }
 0x172   : > { %v1795_v61 = vadd.f32 %v1637_v60, %v1477_v44  ;;  %v876_v62 = vpop.f32.mrb[1].mxu0 }
 0x173   : > { %v1796_v63 = vadd.f32 %v876_v62, %v376_v45 }
 0x174   : > { %1068 = vst [vmem:[%s2422_s19 + $0x8] sm:$0xff] %v1795_v61 }
 0x175   : > { %1067 = vst [vmem:[%s2422_s19] sm:$0xff] %v1796_v63  ;;  %v1640_v0 = vpop.f32.mrb[2].mxu0 }
 0x176   : > { %v1797_v1 = vadd.f32 %v1640_v0, %v1480_v46  ;;  %v886_v2 = vpop.f32.mrb[3].mxu0 }
 0x177   : > { %v1798_v3 = vadd.f32 %v886_v2, %v386_v47 }
 0x178   : > { %1070 = vst [vmem:[%s2422_s19 + $0x18] sm:$0xff] %v1797_v1 }
 0x179   : > { %1069 = vst [vmem:[%s2422_s19 + $0x10] sm:$0xff] %v1798_v3  ;;  %v1643_v4 = vpop.f32.mrb[4].mxu0 }
 0x17a   : > { %v1799_v5 = vadd.f32 %v1643_v4, %v1483_v48  ;;  %v896_v6 = vpop.f32.mrb[5].mxu0 }
 0x17b   : > { %v1800_v7 = vadd.f32 %v896_v6, %v396_v49 }
 0x17c   : > { %1072 = vst [vmem:[%s2422_s19 + $0x28] sm:$0xff] %v1799_v5 }
 0x17d   : > { %1071 = vst [vmem:[%s2422_s19 + $0x20] sm:$0xff] %v1800_v7  ;;  %v1646_v8 = vpop.f32.mrb[6].mxu0 }
 0x17e   : > { %v1801_v9 = vadd.f32 %v1646_v8, %v1486_v50  ;;  %v906_v10 = vpop.f32.mrb[7].mxu0 }
 0x17f   : > { %v1802_v11 = vadd.f32 %v906_v10, %v406_v51 }
 0x180   : > { %1074 = vst [vmem:[%s2422_s19 + $0x38] sm:$0xff] %v1801_v9 }
 0x181   : > { %1073 = vst [vmem:[%s2422_s19 + $0x30] sm:$0xff] %v1802_v11  ;;  %v1649_v12 = vpop.f32.mrb[8].mxu0 }
 0x182   : > { %v1803_v13 = vadd.f32 %v1649_v12, %v1489_v52  ;;  %v916_v14 = vpop.f32.mrb[9].mxu0 }
 0x183   : > { %v1804_v15 = vadd.f32 %v916_v14, %v416_v53 }
 0x184   : > { %1076 = vst [vmem:[%s2422_s19 + $0x48] sm:$0xff] %v1803_v13 }
 0x185   : > { %1075 = vst [vmem:[%s2422_s19 + $0x40] sm:$0xff] %v1804_v15  ;;  %v1652_v16 = vpop.f32.mrb[10].mxu0 }
 0x186   : > { %v1805_v17 = vadd.f32 %v1652_v16, %v1492_v54  ;;  %v926_v18 = vpop.f32.mrb[11].mxu0 }
 0x187   : > { %v1806_v19 = vadd.f32 %v926_v18, %v426_v55 }
 0x188   : > { %1078 = vst [vmem:[%s2422_s19 + $0x58] sm:$0xff] %v1805_v17 }
 0x189   : > { %1077 = vst [vmem:[%s2422_s19 + $0x50] sm:$0xff] %v1806_v19  ;;  %v1655_v20 = vpop.f32.mrb[12].mxu0 }
 0x18a   : > { %v1807_v21 = vadd.f32 %v1655_v20, %v1495_v56  ;;  %v936_v22 = vpop.f32.mrb[13].mxu0 }
 0x18b   : > { %v1808_v23 = vadd.f32 %v936_v22, %v436_v57 }
 0x18c   : > { %1080 = vst [vmem:[%s2422_s19 + $0x68] sm:$0xff] %v1807_v21 }
 0x18d   : > { %1079 = vst [vmem:[%s2422_s19 + $0x60] sm:$0xff] %v1808_v23  ;;  %v1658_v24 = vpop.f32.mrb[14].mxu0 }
 0x18e   : > { %v1809_v25 = vadd.f32 %v1658_v24, %v1498_v58  ;;  %v946_v26 = vpop.f32.mrb[15].mxu0 }
 0x18f   : > { %v1810_v27 = vadd.f32 %v946_v26, %v446_v59 }
 0x190   : > { %1082 = vst [vmem:[%s2422_s19 + $0x78] sm:$0xff] %v1809_v25  ;;  %v1581_v28 = vpop.f32.mrb[16].mxu1 }
 0x191   : > { %1081 = vst [vmem:[%s2422_s19 + $0x70] sm:$0xff] %v1810_v27  ;;  %v1661_v29 = vpop.f32.mrb[16].mxu0  ;;  %v681_v30 = vpop.f32.mrb[17].mxu1 }
 0x192   : > { %v1811_v31 = vadd.f32 %v1661_v29, %v1581_v28  ;;  %v956_v32 = vpop.f32.mrb[17].mxu0 }
 0x193   : > { %v1812_v33 = vadd.f32 %v956_v32, %v681_v30 }
 0x194   : > { %1084 = vst [vmem:[%s2422_s19 + $0x88] sm:$0xff] %v1811_v31  ;;  %v1584_v34 = vpop.f32.mrb[18].mxu1 }
 0x195   : > { %1083 = vst [vmem:[%s2422_s19 + $0x80] sm:$0xff] %v1812_v33  ;;  %v1664_v35 = vpop.f32.mrb[18].mxu0  ;;  %v691_v36 = vpop.f32.mrb[19].mxu1 }
 0x196   : > { %v1813_v37 = vadd.f32 %v1664_v35, %v1584_v34  ;;  %v966_v38 = vpop.f32.mrb[19].mxu0 }
 0x197   : > { %v1814_v39 = vadd.f32 %v966_v38, %v691_v36 }
 0x198   : > { %1086 = vst [vmem:[%s2422_s19 + $0x98] sm:$0xff] %v1813_v37  ;;  %v1587_v40 = vpop.f32.mrb[20].mxu1 }
 0x199   : > { %1085 = vst [vmem:[%s2422_s19 + $0x90] sm:$0xff] %v1814_v39  ;;  %v1667_v41 = vpop.f32.mrb[20].mxu0  ;;  %v701_v42 = vpop.f32.mrb[21].mxu1 }
 0x19a   : > { %v1815_v43 = vadd.f32 %v1667_v41, %v1587_v40  ;;  %v976_v44 = vpop.f32.mrb[21].mxu0 }
 0x19b   : > { %v1816_v45 = vadd.f32 %v976_v44, %v701_v42 }
 0x19c   : > { %1088 = vst [vmem:[%s2422_s19 + $0xa8] sm:$0xff] %v1815_v43  ;;  %v1590_v46 = vpop.f32.mrb[22].mxu1 }
 0x19d   : > { %1087 = vst [vmem:[%s2422_s19 + $0xa0] sm:$0xff] %v1816_v45  ;;  %v1670_v47 = vpop.f32.mrb[22].mxu0  ;;  %v711_v48 = vpop.f32.mrb[23].mxu1 }
 0x19e   : > { %v1817_v49 = vadd.f32 %v1670_v47, %v1590_v46  ;;  %v986_v50 = vpop.f32.mrb[23].mxu0 }
 0x19f   : > { %v1818_v51 = vadd.f32 %v986_v50, %v711_v48 }
 0x1a0   : > { %1090 = vst [vmem:[%s2422_s19 + $0xb8] sm:$0xff] %v1817_v49  ;;  %v1593_v52 = vpop.f32.mrb[24].mxu1 }
 0x1a1   : > { %1089 = vst [vmem:[%s2422_s19 + $0xb0] sm:$0xff] %v1818_v51  ;;  %v1673_v53 = vpop.f32.mrb[24].mxu0  ;;  %v721_v54 = vpop.f32.mrb[25].mxu1 }
 0x1a2   : > { %v1819_v55 = vadd.f32 %v1673_v53, %v1593_v52  ;;  %v996_v56 = vpop.f32.mrb[25].mxu0 }
 0x1a3   : > { %v1820_v57 = vadd.f32 %v996_v56, %v721_v54 }
 0x1a4   : > { %1092 = vst [vmem:[%s2422_s19 + $0xc8] sm:$0xff] %v1819_v55  ;;  %v1596_v58 = vpop.f32.mrb[26].mxu1 }
 0x1a5   : > { %1091 = vst [vmem:[%s2422_s19 + $0xc0] sm:$0xff] %v1820_v57  ;;  %v1676_v59 = vpop.f32.mrb[26].mxu0  ;;  %v731_v60 = vpop.f32.mrb[27].mxu1 }
 0x1a6   : > { %v1821_v61 = vadd.f32 %v1676_v59, %v1596_v58  ;;  %v1006_v62 = vpop.f32.mrb[27].mxu0 }
 0x1a7   : > { %v1822_v63 = vadd.f32 %v1006_v62, %v731_v60 }
 0x1a8   : > { %1094 = vst [vmem:[%s2422_s19 + $0xd8] sm:$0xff] %v1821_v61  ;;  %v1599_v0 = vpop.f32.mrb[28].mxu1 }
 0x1a9   : > { %1093 = vst [vmem:[%s2422_s19 + $0xd0] sm:$0xff] %v1822_v63  ;;  %v1679_v1 = vpop.f32.mrb[28].mxu0  ;;  %v741_v2 = vpop.f32.mrb[29].mxu1 }
 0x1aa   : > { %v1823_v3 = vadd.f32 %v1679_v1, %v1599_v0  ;;  %v1016_v4 = vpop.f32.mrb[29].mxu0 }
 0x1ab   : > { %v1824_v5 = vadd.f32 %v1016_v4, %v741_v2 }
 0x1ac   : > { %1096 = vst [vmem:[%s2422_s19 + $0xe8] sm:$0xff] %v1823_v3  ;;  %v1602_v6 = vpop.f32.mrb[30].mxu1 }
 0x1ad   : > { %1095 = vst [vmem:[%s2422_s19 + $0xe0] sm:$0xff] %v1824_v5  ;;  %v1682_v7 = vpop.f32.mrb[30].mxu0  ;;  %v751_v8 = vpop.f32.mrb[31].mxu1 }
 0x1ae   : > { %v1825_v9 = vadd.f32 %v1682_v7, %v1602_v6  ;;  %v1026_v10 = vpop.f32.mrb[31].mxu0 }
 0x1af   : > { %v1826_v11 = vadd.f32 %v1026_v10, %v751_v8 }
 0x1b0   : > { %1098 = vst [vmem:[%s2422_s19 + $0xf8] sm:$0xff] %v1825_v9 }
 0x1b1   : > { %1097 = vst [vmem:[%s2422_s19 + $0xf0] sm:$0xff] %v1826_v11 }
 0x1b2   : > { %2010 = shalt.err (!%p2007_p5)
}
 0x1b3   : > { %s2011_s4 = scalar_lea.hbm %s2459_s3, 4096  ;;  %s2015_s24 = scalar_lea.hbm %s2514_s2, 8192 }
 0x1b4   : > { %p2012_p9 = scmp.ne.s32.totalorder %s2459_s3, %s2011_s4  ;;  %p2016_p3 = scmp.lt.u32.totalorder %s2459_s3, %s2514_s2 }
 0x1b5   : > { %p2017_p7 = scmp.lt.u32.totalorder %s2015_s24, %s2011_s4  ;;  %p2019_p4 = scmp.lt.u32.totalorder %s2011_s4, %s2459_s3 }
 0x1b6   : > { %p2013_p1 = pnand %p2012_p9, %p2202_p10 }
 0x1b7   : > { %p2018_p11 = por %p2017_p7, %p2016_p3 }
 0x1b8   : > { %p2014_p2 = pneg %p2013_p1 }
 0x1b9   : > { %p2020_p6 = por %p2019_p4, %p2018_p11 }
 0x1bb   : > { %p2021_p8 = pnand %p2020_p6, %p2014_p2 }
 0x1bd   : > { %2024 = shalt.err (!%p2021_p8)
}
 0x1be   : > { %s2090_s17 = smov 128   ;;  %s2091_s19 = smov 8  }
 0x1bf   : > { %1868 = dma.vmem_to_hbm [thread:$0]  (%p2202_p10), %s2461_s6, 4096, %s2459_s3, %s1100_s12, %s2090_s17, %s2090_s17, %s2091_s19  }
 0x1c0 PF: > { %s1132_s21 = sand.u32 1, %s2063_s9   ;;  %p2531_p12 = scmp.ne.s32.totalorder %s2522_s20, 0 }
 0x1c1   : > { %p2532_p13 = scmp.ge.s32.totalorder %s2083_s14, 2  ;;  %s1133_s7 = scalar_lea.sflag [#allocation4], %s1132_s21 }
 0x1c3   : > { %p1879_p0 = pnand %p2532_p13, %p2531_p12 }
 0x1c5   : > { %2058 = dma.done.wait (!%p1879_p0), %s1133_s7, 4096  }
 0x1c6   : > { %2060 = vsyncadd (!%p1879_p0), %s1133_s7, 4294963200  ;;  %s19_s14 = sadd.s32 1, %s2083_s14   ;;  %s2533_s9 = smov %s2067_s10 }
 0x1c7   : > { %p16_p5 = scmp.ge.s32.totalorder %s19_s14, 4   ;;  %s2534_s10 = smov %s2071_s11 }
 0x1c8   : > { %s2535_s11 = smov %s2211_s28  ;;  %s2536_s12 = smov %s2079_s13 }
 0x1c9   : > { %s2537_s13 = smov %s2539_s25  ;;  %18 = sbr.rel (!%p16_p5) target bundleno = 7 (0x7), region = 82 }
 0x1d0   :  { %1138 = vsyncpa [#allocation3], 1 }
 0x1d1   :  { %1140 = vsyncpa [#allocation3 + $0x1], 1 }
 0x1d2   :  { %1141 = vsyncpa [#allocation6], 1 }
 0x1d3   :  { %1142 = vsyncpa [#allocation4], 1 }
 0x1d4   :  { %1144 = vsyncpa [#allocation4 + $0x1], 1 }

</bundles_post_ra>
